<compile_context>
chip_gen: v5e
topology: v5e:2x2
jax: 0.10.0
libtpu: 0.0.40
codegen_flags: <defaults>
</compile_context>

<pallas_src>
import functools

import jax
import jax.numpy as jnp
from jax.experimental import pallas as pl
from jax.experimental.pallas import tpu as pltpu

ALPHA = 1.67326
SCALE = 1.0507

_IN = 784        # 28*28, kept unpadded (block dim == full array dim)
_H1 = 256
_H2_PAD = 128    # 64  -> 128 (lane multiple; padded cols have zero W and b)
_OUT_PAD = 128   # 10  -> 128 (lane-dense store; extra cols sliced off outside)
_MAX_TILE_B = 1024


def _welu(x):
    # WELU semantics from the PyTorch module:
    #   weighted = x * scale
    #   weighted[x < 0] = alpha * (exp(x[x < 0] * scale) - 1)
    # Clamp the exp argument to <= 0 so the unselected branch never makes inf
    # (exact for the selected x < 0 branch).
    neg = ALPHA * (jnp.exp(jnp.minimum(x, 0.0) * SCALE) - 1.0)
    return jnp.where(x < 0.0, neg, x * SCALE)


def _mlp_kernel(x_ref, w1_ref, b1_ref, w2_ref, b2_ref, w3_ref, b3_ref, o_ref):
    # x streams from HBM in its native f32 layout; cast right before the dot.
    x = x_ref[...].astype(w1_ref.dtype)
    # Layer 1: (tb, 784) @ (784, 256) -- dominant matmul, MXU, f32 accumulate.
    h1 = jnp.dot(x, w1_ref[...], preferred_element_type=jnp.float32)
    h1 = _welu(h1 + b1_ref[...])
    # Layer 2: (tb, 256) @ (256, 128).
    h2 = jnp.dot(h1.astype(w2_ref.dtype), w2_ref[...],
                 preferred_element_type=jnp.float32)
    h2 = _welu(h2 + b2_ref[...])
    # Layer 3: (tb, 128) @ (128, 128) -> lane-dense (tb, 128) store.
    o = jnp.dot(h2.astype(w3_ref.dtype), w3_ref[...],
                preferred_element_type=jnp.float32)
    o_ref[...] = (o + b3_ref[...]).astype(o_ref.dtype)


def _round_up(n, m):
    return ((n + m - 1) // m) * m


def _cdiv(a, b):
    return (a + b - 1) // b


def _choose_tiling(B, max_tile_b):
    """Pick (tb, Bp): tb multiple of 8, >=2 grid steps for non-tiny batches
    (v7x megacore), batch padding bounded to < one sublane-aligned sliver."""
    B8 = _round_up(B, 8)
    if B8 <= 16:                       # tiny batch: single step
        return B8, B8
    n_steps = max(2, _cdiv(B8, max_tile_b))
    tb = _round_up(_cdiv(B8, n_steps), 8)
    return tb, tb * n_steps


@functools.partial(jax.jit, static_argnames=("max_tile_b", "use_bf16"))
def welu_mnist_net(x, params, *, max_tile_b=_MAX_TILE_B, use_bf16=True):
    """x: array flattenable to (B, 784); params: dict of w1,b1,w2,b2,w3,b3."""
    x = x.reshape(-1, _IN).astype(jnp.float32)   # mirrors torch's x.view(-1, 784)
    B = x.shape[0]

    tb, Bp = _choose_tiling(B, max_tile_b)
    if Bp != B:
        # Row-only pad (no dtype cast, no lane pad). Padded rows are
        # independent in this MLP and get sliced off below.
        x = jnp.pad(x, ((0, Bp - B), (0, 0)))

    mat_dt = jnp.bfloat16 if use_bf16 else jnp.float32
    out_dt = mat_dt   # bf16 writeback halves output HBM traffic on bf16 path

    # Weights: bf16 (or f32) casts/pads only -- tiny vs. activation traffic.
    # Zero-padding is exact: padded hidden2 cols have zero weights and zero
    # bias so WELU(0) = 0, and padded output cols are sliced off.
    w1 = params["w1"].astype(mat_dt)                           # (784, 256)
    b1 = params["b1"].reshape(1, _H1).astype(jnp.float32)
    w2 = jnp.zeros((_H1, _H2_PAD), mat_dt).at[:, :64].set(
        params["w2"].astype(mat_dt))
    b2 = jnp.zeros((1, _H2_PAD), jnp.float32).at[:, :64].set(
        params["b2"].reshape(1, 64).astype(jnp.float32))
    w3 = jnp.zeros((_H2_PAD, _OUT_PAD), mat_dt).at[:64, :10].set(
        params["w3"].astype(mat_dt))
    b3 = jnp.zeros((1, _OUT_PAD), jnp.float32).at[:, :10].set(
        params["b3"].reshape(1, 10).astype(jnp.float32))

    def const_spec(shape):
        nd = len(shape)
        return pl.BlockSpec(shape, lambda i, nd=nd: (0,) * nd)

    grid_spec = pltpu.PrefetchScalarGridSpec(
        num_scalar_prefetch=0,
        grid=(Bp // tb,),
        in_specs=[
            # x tile over batch, native f32, last block dim == full array dim.
            pl.BlockSpec((tb, _IN), lambda i: (i, 0)),
            const_spec(w1.shape),
            const_spec(b1.shape),
            const_spec(w2.shape),
            const_spec(b2.shape),
            const_spec(w3.shape),
            const_spec(b3.shape),
        ],
        out_specs=pl.BlockSpec((tb, _OUT_PAD), lambda i: (i, 0)),
    )

    out = pl.pallas_call(
        _mlp_kernel,
        out_shape=jax.ShapeDtypeStruct((Bp, _OUT_PAD), out_dt),
        grid_spec=grid_spec,
        compiler_params=pltpu.CompilerParams(
            dimension_semantics=("parallel",),
            vmem_limit_bytes=32 * 1024 * 1024,
        ),
    )(x, w1, b1, w2, b2, w3, b3)

    return out[:B, :10].astype(jnp.float32)


def init_params(key):
    k1, k2, k3 = jax.random.split(key, 3)
    # Deterministic synthetic init (shapes match nn.Linear(784,256)/(256,64)/(64,10)),
    # stored as (in, out).
    return {
        "w1": jax.random.normal(k1, (784, 256), jnp.float32) * 0.02,
        "b1": jnp.zeros((256,), jnp.float32),
        "w2": jax.random.normal(k2, (256, 64), jnp.float32) * 0.05,
        "b2": jnp.full((64,), 0.01, jnp.float32),
        "w3": jax.random.normal(k3, (64, 10), jnp.float32) * 0.1,
        "b3": jnp.full((10,), -0.01, jnp.float32),
    }


def _reference(x, params):
    x = x.reshape(-1, 784).astype(jnp.float32)
    h1 = _welu(x @ params["w1"] + params["b1"])
    h2 = _welu(h1 @ params["w2"] + params["b2"])
    return h2 @ params["w3"] + params["b3"]


if __name__ == "__main__":
    key = jax.random.PRNGKey(0)
    kx, kp = jax.random.split(key)
    params = init_params(kp)

    # Small MNIST-shaped batch: exercises view(-1, 784) and the exact f32 path.
    x_small = jax.random.normal(kx, (16, 28, 28), jnp.float32)
    out_small = jax.block_until_ready(welu_mnist_net(x_small, params, use_bf16=False))
    assert out_small.shape == (16, 10)
    assert jnp.allclose(out_small, _reference(x_small, params),
                        rtol=1e-4, atol=1e-4), "f32 path mismatch"

    # Larger batch: two grid steps of tb=256 (pipeline + v7x megacore), bf16 path.
    x_big = jax.random.normal(kx, (512, 784), jnp.float32)
    out_big = jax.block_until_ready(welu_mnist_net(x_big, params, use_bf16=True))
    assert out_big.shape == (512, 10)
    assert jnp.allclose(out_big, _reference(x_big, params),
                        rtol=5e-2, atol=5e-2), "bf16 path mismatch"

    # Ragged small batch exercises the row-padding path.
    x_rag = jax.random.normal(kx, (10, 784), jnp.float32)
    out_rag = jax.block_until_ready(welu_mnist_net(x_rag, params, use_bf16=False))
    assert out_rag.shape == (10, 10)
    assert jnp.allclose(out_rag, _reference(x_rag, params),
                        rtol=1e-4, atol=1e-4), "ragged-batch mismatch"

    print("KERNEL_OK")
</pallas_src>

<mosaic_0001>
module attributes {stable_mosaic.version = 11 : i64} {
  func.func @_mlp_kernel(%arg0: i32, %arg1: memref<16x784xf32, #tpu.memory_space<vmem>>, %arg2: memref<784x256xf32, #tpu.memory_space<vmem>>, %arg3: memref<1x256xf32, #tpu.memory_space<vmem>>, %arg4: memref<256x128xf32, #tpu.memory_space<vmem>>, %arg5: memref<1x128xf32, #tpu.memory_space<vmem>>, %arg6: memref<128x128xf32, #tpu.memory_space<vmem>>, %arg7: memref<1x128xf32, #tpu.memory_space<vmem>>, %arg8: memref<16x128xf32, #tpu.memory_space<vmem>>) attributes {dimension_semantics = [#tpu.dimension_semantics<parallel>], iteration_bounds = array<i64: 1>, scalar_prefetch = 0 : i64, scratch_operands = 0 : i64, tpu.core_type = #tpu.core_type<tc>, window_params = [{transform_indices = @transform_0, window_bounds = array<i64: 16, 784>}, {pipeline_mode = #tpu.pipeline_mode<synchronous>, transform_indices = @transform_1, window_bounds = array<i64: 784, 256>}, {pipeline_mode = #tpu.pipeline_mode<synchronous>, transform_indices = @transform_2, window_bounds = array<i64: 1, 256>}, {pipeline_mode = #tpu.pipeline_mode<synchronous>, transform_indices = @transform_3, window_bounds = array<i64: 256, 128>}, {pipeline_mode = #tpu.pipeline_mode<synchronous>, transform_indices = @transform_4, window_bounds = array<i64: 1, 128>}, {pipeline_mode = #tpu.pipeline_mode<synchronous>, transform_indices = @transform_5, window_bounds = array<i64: 128, 128>}, {pipeline_mode = #tpu.pipeline_mode<synchronous>, transform_indices = @transform_6, window_bounds = array<i64: 1, 128>}, {transform_indices = @transform_7, window_bounds = array<i64: 16, 128>}]} {
    %c0 = arith.constant 0 : index
    %c0_0 = arith.constant 0 : index
    %0 = vector.load %arg1[%c0, %c0_0] : memref<16x784xf32, #tpu.memory_space<vmem>>, vector<16x784xf32>
    %c0_1 = arith.constant 0 : index
    %c0_2 = arith.constant 0 : index
    %1 = vector.load %arg2[%c0_1, %c0_2] : memref<784x256xf32, #tpu.memory_space<vmem>>, vector<784x256xf32>
    %cst = arith.constant dense<0.000000e+00> : vector<16x256xf32>
    %2 = tpu.matmul %0, %1, %cst {dimension_numbers = #tpu.dot_dimension_numbers<[1], [0], [0], [1], [0, 0, 1, 1], [], []>} : vector<16x784xf32>, vector<784x256xf32>, vector<16x256xf32> -> vector<16x256xf32>
    %c0_3 = arith.constant 0 : index
    %c0_4 = arith.constant 0 : index
    %3 = vector.load %arg3[%c0_3, %c0_4] : memref<1x256xf32, #tpu.memory_space<vmem>>, vector<1x256xf32>
    %4 = vector.broadcast %3 : vector<1x256xf32> to vector<16x256xf32>
    %5 = arith.addf %2, %4 : vector<16x256xf32>
    %cst_5 = arith.constant 0.000000e+00 : f32
    %6 = vector.broadcast %cst_5 : f32 to vector<16x256xf32>
    %7 = arith.minimumf %5, %6 : vector<16x256xf32>
    %cst_6 = arith.constant 1.050700e+00 : f32
    %8 = vector.broadcast %cst_6 : f32 to vector<16x256xf32>
    %9 = arith.mulf %7, %8 : vector<16x256xf32>
    %10 = math.exp %9 : vector<16x256xf32>
    %cst_7 = arith.constant 1.000000e+00 : f32
    %11 = vector.broadcast %cst_7 : f32 to vector<16x256xf32>
    %12 = arith.subf %10, %11 : vector<16x256xf32>
    %cst_8 = arith.constant 1.673260e+00 : f32
    %13 = vector.broadcast %cst_8 : f32 to vector<16x256xf32>
    %14 = arith.mulf %13, %12 : vector<16x256xf32>
    %cst_9 = arith.constant 0.000000e+00 : f32
    %15 = vector.broadcast %cst_9 : f32 to vector<16x256xf32>
    %16 = arith.cmpf olt, %5, %15 : vector<16x256xf32>
    %cst_10 = arith.constant 1.050700e+00 : f32
    %17 = vector.broadcast %cst_10 : f32 to vector<16x256xf32>
    %18 = arith.mulf %5, %17 : vector<16x256xf32>
    %19 = arith.select %16, %14, %18 : vector<16x256xi1>, vector<16x256xf32>
    %c0_11 = arith.constant 0 : index
    %c0_12 = arith.constant 0 : index
    %20 = vector.load %arg4[%c0_11, %c0_12] : memref<256x128xf32, #tpu.memory_space<vmem>>, vector<256x128xf32>
    %cst_13 = arith.constant dense<0.000000e+00> : vector<16x128xf32>
    %21 = tpu.matmul %19, %20, %cst_13 {dimension_numbers = #tpu.dot_dimension_numbers<[1], [0], [0], [1], [0, 0, 1, 1], [], []>} : vector<16x256xf32>, vector<256x128xf32>, vector<16x128xf32> -> vector<16x128xf32>
    %c0_14 = arith.constant 0 : index
    %c0_15 = arith.constant 0 : index
    %22 = vector.load %arg5[%c0_14, %c0_15] : memref<1x128xf32, #tpu.memory_space<vmem>>, vector<1x128xf32>
    %23 = vector.broadcast %22 : vector<1x128xf32> to vector<16x128xf32>
    %24 = arith.addf %21, %23 : vector<16x128xf32>
    %cst_16 = arith.constant 0.000000e+00 : f32
    %25 = vector.broadcast %cst_16 : f32 to vector<16x128xf32>
    %26 = arith.minimumf %24, %25 : vector<16x128xf32>
    %cst_17 = arith.constant 1.050700e+00 : f32
    %27 = vector.broadcast %cst_17 : f32 to vector<16x128xf32>
    %28 = arith.mulf %26, %27 : vector<16x128xf32>
    %29 = math.exp %28 : vector<16x128xf32>
    %cst_18 = arith.constant 1.000000e+00 : f32
    %30 = vector.broadcast %cst_18 : f32 to vector<16x128xf32>
    %31 = arith.subf %29, %30 : vector<16x128xf32>
    %cst_19 = arith.constant 1.673260e+00 : f32
    %32 = vector.broadcast %cst_19 : f32 to vector<16x128xf32>
    %33 = arith.mulf %32, %31 : vector<16x128xf32>
    %cst_20 = arith.constant 0.000000e+00 : f32
    %34 = vector.broadcast %cst_20 : f32 to vector<16x128xf32>
    %35 = arith.cmpf olt, %24, %34 : vector<16x128xf32>
    %cst_21 = arith.constant 1.050700e+00 : f32
    %36 = vector.broadcast %cst_21 : f32 to vector<16x128xf32>
    %37 = arith.mulf %24, %36 : vector<16x128xf32>
    %38 = arith.select %35, %33, %37 : vector<16x128xi1>, vector<16x128xf32>
    %c0_22 = arith.constant 0 : index
    %c0_23 = arith.constant 0 : index
    %39 = vector.load %arg6[%c0_22, %c0_23] : memref<128x128xf32, #tpu.memory_space<vmem>>, vector<128x128xf32>
    %cst_24 = arith.constant dense<0.000000e+00> : vector<16x128xf32>
    %40 = tpu.matmul %38, %39, %cst_24 {dimension_numbers = #tpu.dot_dimension_numbers<[1], [0], [0], [1], [0, 0, 1, 1], [], []>} : vector<16x128xf32>, vector<128x128xf32>, vector<16x128xf32> -> vector<16x128xf32>
    %c0_25 = arith.constant 0 : index
    %c0_26 = arith.constant 0 : index
    %41 = vector.load %arg7[%c0_25, %c0_26] : memref<1x128xf32, #tpu.memory_space<vmem>>, vector<1x128xf32>
    %42 = vector.broadcast %41 : vector<1x128xf32> to vector<16x128xf32>
    %43 = arith.addf %40, %42 : vector<16x128xf32>
    %c0_27 = arith.constant 0 : index
    %c0_28 = arith.constant 0 : index
    %44 = vector.load %arg8[%c0_27, %c0_28] : memref<16x128xf32, #tpu.memory_space<vmem>>, vector<16x128xf32>
    tpu.vector_store %arg8[%c0_27, %c0_28], %43 {strides = array<i32>} : memref<16x128xf32, #tpu.memory_space<vmem>>, vector<16x128xf32>,
    return
  }
  func.func @transform_0(%arg0: i32) -> (i32, i32) {
    %c0_i32 = arith.constant 0 : i32
    %c0_i32_0 = arith.constant 0 : i32
    return %arg0, %c0_i32 : i32, i32
  }
  func.func @transform_1(%arg0: i32) -> (i32, i32) {
    %c0_i32 = arith.constant 0 : i32
    %c0_i32_0 = arith.constant 0 : i32
    %c0_i32_1 = arith.constant 0 : i32
    return %c0_i32, %c0_i32_0 : i32, i32
  }
  func.func @transform_2(%arg0: i32) -> (i32, i32) {
    %c0_i32 = arith.constant 0 : i32
    %c0_i32_0 = arith.constant 0 : i32
    %c0_i32_1 = arith.constant 0 : i32
    return %c0_i32, %c0_i32_0 : i32, i32
  }
  func.func @transform_3(%arg0: i32) -> (i32, i32) {
    %c0_i32 = arith.constant 0 : i32
    %c0_i32_0 = arith.constant 0 : i32
    %c0_i32_1 = arith.constant 0 : i32
    return %c0_i32, %c0_i32_0 : i32, i32
  }
  func.func @transform_4(%arg0: i32) -> (i32, i32) {
    %c0_i32 = arith.constant 0 : i32
    %c0_i32_0 = arith.constant 0 : i32
    %c0_i32_1 = arith.constant 0 : i32
    return %c0_i32, %c0_i32_0 : i32, i32
  }
  func.func @transform_5(%arg0: i32) -> (i32, i32) {
    %c0_i32 = arith.constant 0 : i32
    %c0_i32_0 = arith.constant 0 : i32
    %c0_i32_1 = arith.constant 0 : i32
    return %c0_i32, %c0_i32_0 : i32, i32
  }
  func.func @transform_6(%arg0: i32) -> (i32, i32) {
    %c0_i32 = arith.constant 0 : i32
    %c0_i32_0 = arith.constant 0 : i32
    %c0_i32_1 = arith.constant 0 : i32
    return %c0_i32, %c0_i32_0 : i32, i32
  }
  func.func @transform_7(%arg0: i32) -> (i32, i32) {
    %c0_i32 = arith.constant 0 : i32
    %c0_i32_0 = arith.constant 0 : i32
    return %arg0, %c0_i32 : i32, i32
  }
}

</mosaic_0001>

<bundles_post_ra>
// kernel: welu_mnist_net.1
= control target key start
LH: loop header
LB: loop body
LE: loop exit
PB: predicated region body
PF: predicated region fallthrough
CT: control target
= control target key end

     0   :  { %vm243_vm0 = vcmask 130048   ;;  %s1717_s0 = inlined_call_operand.vmem [shape: f32[16,784], index: 0, kind: input, shape index: {}]   ;;  %s1718_s1 = inlined_call_operand.vmem [shape: f32[784,256], index: 1, kind: input, shape index: {}]   ;;  %s1719_s2 = inlined_call_operand.vmem [shape: f32[1,256], index: 2, kind: input, shape index: {}]   ;;  %s1720_s3 = inlined_call_operand.vmem [shape: f32[256,128], index: 3, kind: input, shape index: {}]   ;;  %s1721_s4 = inlined_call_operand.vmem [shape: f32[1,128], index: 4, kind: input, shape index: {}]   ;;  %s1722_s5 = inlined_call_operand.vmem [shape: f32[128,128], index: 5, kind: input, shape index: {}]   ;;  %s1723_s6 = inlined_call_operand.vmem [shape: f32[1,128], index: 6, kind: input, shape index: {}]   ;;  %s1724_s7 = inlined_call_operand.hbm [shape: f32[16,128], index: 7, kind: output, shape index: {}]  }
   0x1   :  { %v71_v0 = vld [vmem:[%s1718_s1 + $0xf0] sm:$0xff]  ;;  %v69_v3 = vld [vmem:[%s1718_s1 + $0xe0] sm:$0xff] }
   0x2   :  { %v135_v1 = vld [vmem:[%s1718_s1 + $0x2f0] sm:$0xff]  ;;  %250 = vmatpush.msra.mxu0 %v71_v0  ;;  %v133_v5 = vld [vmem:[%s1718_s1 + $0x2e0] sm:$0xff] }
   0x3   :  { %v167_v2 = vld [vmem:[%s1718_s1 + $0x3f0] sm:$0xff]  ;;  %296 = vmatpush.msra.mxu2 %v135_v1  ;;  %v165_v6 = vld [vmem:[%s1718_s1 + $0x3e0] sm:$0xff]  ;;  %v72_v1 = vld [vmem:[%s1718_s1 + $0xf8] sm:$0xff] }
   0x4   :  { %v103_v4 = vld [vmem:[%s1718_s1 + $0x1f0] sm:$0xff]  ;;  %319 = vmatpush.msra.mxu3 %v167_v2  ;;  %v101_v8 = vld [vmem:[%s1718_s1 + $0x1e0] sm:$0xff]  ;;  %251 = vmatpush.msra.mxu0 %v69_v3 }
   0x5   :  { %273 = vmatpush.msra.mxu1 %v103_v4  ;;  %v67_v7 = vld [vmem:[%s1718_s1 + $0xd0] sm:$0xff]  ;;  %297 = vmatpush.msra.mxu2 %v133_v5  ;;  %v65_v11 = vld [vmem:[%s1718_s1 + $0xc0] sm:$0xff] }
   0x6   :  { %v131_v9 = vld [vmem:[%s1718_s1 + $0x2d0] sm:$0xff]  ;;  %320 = vmatpush.msra.mxu3 %v165_v6  ;;  %v129_v13 = vld [vmem:[%s1718_s1 + $0x2c0] sm:$0xff]  ;;  %252 = vmatpush.msra.mxu0 %v67_v7  ;;  %v70_v6 = vld [vmem:[%s1718_s1 + $0xe8] sm:$0xff] }
   0x7   :  { %v163_v10 = vld [vmem:[%s1718_s1 + $0x3d0] sm:$0xff]  ;;  %274 = vmatpush.msra.mxu1 %v101_v8  ;;  %298 = vmatpush.msra.mxu2 %v131_v9  ;;  %v161_v14 = vld [vmem:[%s1718_s1 + $0x3c0] sm:$0xff]  ;;  %v104_v8 = vld [vmem:[%s1718_s1 + $0x1f8] sm:$0xff] }
   0x8   :  { %v99_v12 = vld [vmem:[%s1718_s1 + $0x1d0] sm:$0xff]  ;;  %v97_v15 = vld [vmem:[%s1718_s1 + $0x1c0] sm:$0xff]  ;;  %321 = vmatpush.msra.mxu3 %v163_v10  ;;  %253 = vmatpush.msra.mxu0 %v65_v11  ;;  %v68_v11 = vld [vmem:[%s1718_s1 + $0xd8] sm:$0xff] }
   0x9   :  { %275 = vmatpush.msra.mxu1 %v99_v12  ;;  %v63_v16 = vld [vmem:[%s1718_s1 + $0xb0] sm:$0xff]  ;;  %299 = vmatpush.msra.mxu2 %v129_v13  ;;  %v61_v20 = vld [vmem:[%s1718_s1 + $0xa0] sm:$0xff]  ;;  %v1106_v13 = vld [vmem:[%s1717_s0 + $0x18] sm:$0xff] }
   0xa   :  { %v127_v17 = vld [vmem:[%s1718_s1 + $0x2b0] sm:$0xff]  ;;  %322 = vmatpush.msra.mxu3 %v161_v14  ;;  %v125_v21 = vld [vmem:[%s1718_s1 + $0x2a0] sm:$0xff]  ;;  %254 = vmatpush.msra.mxu0 %v63_v16  ;;  %v102_v14 = vld [vmem:[%s1718_s1 + $0x1e8] sm:$0xff] }
   0xb   :  { %v159_v18 = vld [vmem:[%s1718_s1 + $0x3b0] sm:$0xff]  ;;  %276 = vmatpush.msra.mxu1 %v97_v15  ;;  %300 = vmatpush.msra.mxu2 %v127_v17  ;;  %v157_v22 = vld [vmem:[%s1718_s1 + $0x3a0] sm:$0xff]  ;;  %v66_v17 = vld [vmem:[%s1718_s1 + $0xc8] sm:$0xff] }
   0xc   :  { %v95_v19 = vld [vmem:[%s1718_s1 + $0x1b0] sm:$0xff]  ;;  %v93_v23 = vld [vmem:[%s1718_s1 + $0x1a0] sm:$0xff]  ;;  %323 = vmatpush.msra.mxu3 %v159_v18  ;;  %255 = vmatpush.msra.mxu0 %v61_v20  ;;  %v1125_v18 = vld [vmem:[%s1717_s0 + $0x8] sm:$0xff] }
   0xd   :  { %277 = vmatpush.msra.mxu1 %v95_v19  ;;  %v59_v24 = vld [vmem:[%s1718_s1 + $0x90] sm:$0xff]  ;;  %301 = vmatpush.msra.mxu2 %v125_v21  ;;  %v57_v28 = vld [vmem:[%s1718_s1 + $0x80] sm:$0xff]  ;;  %v100_v19 = vld [vmem:[%s1718_s1 + $0x1d8] sm:$0xff] }
   0xe   :  { %v123_v25 = vld [vmem:[%s1718_s1 + $0x290] sm:$0xff]  ;;  %324 = vmatpush.msra.mxu3 %v157_v22  ;;  %v121_v29 = vld [vmem:[%s1718_s1 + $0x280] sm:$0xff]  ;;  %256 = vmatpush.msra.mxu0 %v59_v24  ;;  %v64_v22 = vld [vmem:[%s1718_s1 + $0xb8] sm:$0xff] }
   0xf   :  { %v155_v26 = vld [vmem:[%s1718_s1 + $0x390] sm:$0xff]  ;;  %278 = vmatpush.msra.mxu1 %v93_v23  ;;  %302 = vmatpush.msra.mxu2 %v123_v25  ;;  %v153_v30 = vld [vmem:[%s1718_s1 + $0x380] sm:$0xff]  ;;  %v98_v23 = vld [vmem:[%s1718_s1 + $0x1c8] sm:$0xff] }
  0x10   :  { %v91_v27 = vld [vmem:[%s1718_s1 + $0x190] sm:$0xff]  ;;  %v89_v31 = vld [vmem:[%s1718_s1 + $0x180] sm:$0xff]  ;;  %325 = vmatpush.msra.mxu3 %v155_v26  ;;  %257 = vmatpush.msra.mxu0 %v57_v28  ;;  %v62_v26 = vld [vmem:[%s1718_s1 + $0xa8] sm:$0xff] }
  0x11   :  { %279 = vmatpush.msra.mxu1 %v91_v27  ;;  %v55_v32 = vld [vmem:[%s1718_s1 + $0x70] sm:$0xff]  ;;  %303 = vmatpush.msra.mxu2 %v121_v29  ;;  %v53_v36 = vld [vmem:[%s1718_s1 + $0x60] sm:$0xff]  ;;  %v96_v27 = vld [vmem:[%s1718_s1 + $0x1b8] sm:$0xff] }
  0x12   :  { %v119_v33 = vld [vmem:[%s1718_s1 + $0x270] sm:$0xff]  ;;  %326 = vmatpush.msra.mxu3 %v153_v30  ;;  %v117_v37 = vld [vmem:[%s1718_s1 + $0x260] sm:$0xff]  ;;  %258 = vmatpush.msra.mxu0 %v55_v32  ;;  %v60_v30 = vld [vmem:[%s1718_s1 + $0x98] sm:$0xff] }
  0x13   :  { %v151_v34 = vld [vmem:[%s1718_s1 + $0x370] sm:$0xff]  ;;  %280 = vmatpush.msra.mxu1 %v89_v31  ;;  %304 = vmatpush.msra.mxu2 %v119_v33  ;;  %v149_v38 = vld [vmem:[%s1718_s1 + $0x360] sm:$0xff]  ;;  %v94_v31 = vld [vmem:[%s1718_s1 + $0x1a8] sm:$0xff] }
  0x14   :  { %v87_v35 = vld [vmem:[%s1718_s1 + $0x170] sm:$0xff]  ;;  %v85_v39 = vld [vmem:[%s1718_s1 + $0x160] sm:$0xff]  ;;  %327 = vmatpush.msra.mxu3 %v151_v34  ;;  %259 = vmatpush.msra.mxu0 %v53_v36  ;;  %v58_v34 = vld [vmem:[%s1718_s1 + $0x88] sm:$0xff] }
  0x15   :  { %281 = vmatpush.msra.mxu1 %v87_v35  ;;  %v51_v40 = vld [vmem:[%s1718_s1 + $0x50] sm:$0xff]  ;;  %305 = vmatpush.msra.mxu2 %v117_v37  ;;  %v49_v44 = vld [vmem:[%s1718_s1 + $0x40] sm:$0xff]  ;;  %v92_v35 = vld [vmem:[%s1718_s1 + $0x198] sm:$0xff] }
  0x16   :  { %v115_v41 = vld [vmem:[%s1718_s1 + $0x250] sm:$0xff]  ;;  %328 = vmatpush.msra.mxu3 %v149_v38  ;;  %v113_v45 = vld [vmem:[%s1718_s1 + $0x240] sm:$0xff]  ;;  %260 = vmatpush.msra.mxu0 %v51_v40  ;;  %v56_v38 = vld [vmem:[%s1718_s1 + $0x78] sm:$0xff] }
  0x17   :  { %v147_v42 = vld [vmem:[%s1718_s1 + $0x350] sm:$0xff]  ;;  %282 = vmatpush.msra.mxu1 %v85_v39  ;;  %306 = vmatpush.msra.mxu2 %v115_v41  ;;  %v145_v46 = vld [vmem:[%s1718_s1 + $0x340] sm:$0xff]  ;;  %v90_v39 = vld [vmem:[%s1718_s1 + $0x188] sm:$0xff] }
  0x18   :  { %v83_v43 = vld [vmem:[%s1718_s1 + $0x150] sm:$0xff]  ;;  %v81_v47 = vld [vmem:[%s1718_s1 + $0x140] sm:$0xff]  ;;  %329 = vmatpush.msra.mxu3 %v147_v42  ;;  %261 = vmatpush.msra.mxu0 %v49_v44  ;;  %v54_v42 = vld [vmem:[%s1718_s1 + $0x68] sm:$0xff] }
  0x19   :  { %283 = vmatpush.msra.mxu1 %v83_v43  ;;  %v47_v48 = vld [vmem:[%s1718_s1 + $0x30] sm:$0xff]  ;;  %307 = vmatpush.msra.mxu2 %v113_v45  ;;  %v45_v52 = vld [vmem:[%s1718_s1 + $0x20] sm:$0xff]  ;;  %v88_v43 = vld [vmem:[%s1718_s1 + $0x178] sm:$0xff] }
  0x1a   :  { %v111_v49 = vld [vmem:[%s1718_s1 + $0x230] sm:$0xff]  ;;  %330 = vmatpush.msra.mxu3 %v145_v46  ;;  %v109_v53 = vld [vmem:[%s1718_s1 + $0x220] sm:$0xff]  ;;  %262 = vmatpush.msra.mxu0 %v47_v48  ;;  %v52_v46 = vld [vmem:[%s1718_s1 + $0x58] sm:$0xff] }
  0x1b   :  { %v143_v50 = vld [vmem:[%s1718_s1 + $0x330] sm:$0xff]  ;;  %284 = vmatpush.msra.mxu1 %v81_v47  ;;  %308 = vmatpush.msra.mxu2 %v111_v49  ;;  %v141_v54 = vld [vmem:[%s1718_s1 + $0x320] sm:$0xff]  ;;  %v1215_v47 = vld [vmem:[%s1717_s0 + $0x48] sm:$0xff] }
  0x1c   :  { %v79_v51 = vld [vmem:[%s1718_s1 + $0x130] sm:$0xff]  ;;  %v77_v55 = vld [vmem:[%s1718_s1 + $0x120] sm:$0xff]  ;;  %331 = vmatpush.msra.mxu3 %v143_v50  ;;  %263 = vmatpush.msra.mxu0 %v45_v52  ;;  %v86_v48 = vld [vmem:[%s1718_s1 + $0x168] sm:$0xff] }
  0x1d   :  { %285 = vmatpush.msra.mxu1 %v79_v51  ;;  %v43_v56 = vld [vmem:[%s1718_s1 + $0x10] sm:$0xff]  ;;  %309 = vmatpush.msra.mxu2 %v109_v53  ;;  %v41_v60 = vld [vmem:[%s1718_s1] sm:$0xff]  ;;  %v50_v51 = vld [vmem:[%s1718_s1 + $0x48] sm:$0xff] }
  0x1e   :  { %v107_v57 = vld [vmem:[%s1718_s1 + $0x210] sm:$0xff]  ;;  %332 = vmatpush.msra.mxu3 %v141_v54  ;;  %v105_v61 = vld [vmem:[%s1718_s1 + $0x200] sm:$0xff]  ;;  %264 = vmatpush.msra.mxu0 %v43_v56  ;;  %v1233_v52 = vld [vmem:[%s1717_s0 + $0x38] sm:$0xff] }
  0x1f   :  { %v139_v58 = vld [vmem:[%s1718_s1 + $0x310] sm:$0xff]  ;;  %286 = vmatpush.msra.mxu1 %v77_v55  ;;  %310 = vmatpush.msra.mxu2 %v107_v57  ;;  %v137_v62 = vld [vmem:[%s1718_s1 + $0x300] sm:$0xff]  ;;  %v84_v53 = vld [vmem:[%s1718_s1 + $0x158] sm:$0xff] }
  0x20   :  { %v75_v59 = vld [vmem:[%s1718_s1 + $0x110] sm:$0xff]  ;;  %333 = vmatpush.msra.mxu3 %v139_v58  ;;  %265 = vmatpush.msra.mxu0 %v41_v60  ;;  %v73_v2 = vld [vmem:[%s1718_s1 + $0x100] sm:$0xff]  ;;  %v48_v56 = vld [vmem:[%s1718_s1 + $0x38] sm:$0xff] }
  0x21   :  { %v199_v63 = vld [vmem:[%s1718_s1 + $0x4f0] sm:$0xff]  ;;  %287 = vmatpush.msra.mxu1 %v75_v59  ;;  %311 = vmatpush.msra.mxu2 %v105_v61  ;;  %v197_v3 = vld [vmem:[%s1718_s1 + $0x4e0] sm:$0xff]  ;;  %v82_v58 = vld [vmem:[%s1718_s1 + $0x148] sm:$0xff] }
  0x22   :  { %v235_v0 = vld [vmem:[%s1718_s1 + $0x610] sm:$0xff]  ;;  %334 = vmatpush.msra.mxu3 %v137_v62  ;;  %342 = vmatpush.msrb.mxu0 %v199_v63  ;;  %v233_v5 = vld [vmem:[%s1718_s1 + $0x600] sm:$0xff]  ;;  %v46_v61 = vld [vmem:[%s1718_s1 + $0x28] sm:$0xff] }
  0x23   :  { %v231_v4 = vld [vmem:[%s1718_s1 + $0x5f0] sm:$0xff]  ;;  %402 = vmatpush.msrb.mxu2 %v235_v0  ;;  %288 = vmatpush.msra.mxu1 %v73_v2  ;;  %v229_v10 = vld [vmem:[%s1718_s1 + $0x5e0] sm:$0xff]  ;;  %v80_v63 = vld [vmem:[%s1718_s1 + $0x138] sm:$0xff] }
  0x24   :  { %411 = vmatpush.msrb.mxu3 %v72_v1  ;;  %v1083_v7 = vld [vmem:[%s1717_s0 + $0x10] sm:$0xff]  ;;  %343 = vmatpush.msrb.mxu0 %v197_v3  ;;  %v1101_v12 = vld [vmem:[%s1717_s0] sm:$0xff]  ;;  %v44_v2 = vld [vmem:[%s1718_s1 + $0x18] sm:$0xff] }
  0x25   :  { %v195_v9 = vld [vmem:[%s1718_s1 + $0x4d0] sm:$0xff]  ;;  %365 = vmatpush.msrb.mxu1 %v231_v4  ;;  %403 = vmatpush.msrb.mxu2 %v233_v5  ;;  %v193_v15 = vld [vmem:[%s1718_s1 + $0x4c0] sm:$0xff] }
  0x26   :  { %412 = vmatpush.msrb.mxu3 %v70_v6  ;;  %312 = vmatmul.f32.vlgmr.msra.gmra.mxu2 %v1083_v7  ;;  %v227_v16 = vld [vmem:[%s1718_s1 + $0x5d0] sm:$0xff]  ;;  %v225_v21 = vld [vmem:[%s1718_s1 + $0x5c0] sm:$0xff] }
  0x27   :  { %434 = vmatpush.msra.mxu2 %v104_v8  ;;  %344 = vmatpush.msrb.mxu0 %v195_v9  ;;  %v191_v20 = vld [vmem:[%s1718_s1 + $0x4b0] sm:$0xff]  ;;  %v189_v24 = vld [vmem:[%s1718_s1 + $0x4a0] sm:$0xff] }
  0x28   :  { %366 = vmatpush.msrb.mxu1 %v229_v10  ;;  %413 = vmatpush.msrb.mxu3 %v68_v11  ;;  %v223_v25 = vld [vmem:[%s1718_s1 + $0x5b0] sm:$0xff]  ;;  %v221_v29 = vld [vmem:[%s1718_s1 + $0x5a0] sm:$0xff] }
  0x29   :  { %266 = vmatmul.f32.vlgmr.msra.gmra.mxu0 %v1101_v12  ;;  %335 = vmatmul.f32.vlgmr.msra.gmra.mxu3 %v1106_v13  ;;  %v187_v28 = vld [vmem:[%s1718_s1 + $0x490] sm:$0xff]  ;;  %v185_v32 = vld [vmem:[%s1718_s1 + $0x480] sm:$0xff] }
  0x2a   :  { %435 = vmatpush.msra.mxu2 %v102_v14  ;;  %345 = vmatpush.msrb.mxu0 %v193_v15  ;;  %v219_v33 = vld [vmem:[%s1718_s1 + $0x590] sm:$0xff]  ;;  %v217_v37 = vld [vmem:[%s1718_s1 + $0x580] sm:$0xff] }
  0x2b   :  { %367 = vmatpush.msrb.mxu1 %v227_v16  ;;  %414 = vmatpush.msrb.mxu3 %v66_v17  ;;  %v183_v36 = vld [vmem:[%s1718_s1 + $0x470] sm:$0xff]  ;;  %v181_v40 = vld [vmem:[%s1718_s1 + $0x460] sm:$0xff] }
  0x2c   :  { %289 = vmatmul.f32.vlgmr.msra.gmra.mxu1 %v1125_v18  ;;  %436 = vmatpush.msra.mxu2 %v100_v19  ;;  %v215_v41 = vld [vmem:[%s1718_s1 + $0x570] sm:$0xff]  ;;  %v213_v45 = vld [vmem:[%s1718_s1 + $0x560] sm:$0xff] }
  0x2d   :  { %346 = vmatpush.msrb.mxu0 %v191_v20  ;;  %368 = vmatpush.msrb.mxu1 %v225_v21  ;;  %v179_v44 = vld [vmem:[%s1718_s1 + $0x450] sm:$0xff]  ;;  %v177_v49 = vld [vmem:[%s1718_s1 + $0x440] sm:$0xff] }
  0x2e   :  { %415 = vmatpush.msrb.mxu3 %v64_v22  ;;  %437 = vmatpush.msra.mxu2 %v98_v23  ;;  %v211_v50 = vld [vmem:[%s1718_s1 + $0x550] sm:$0xff]  ;;  %v209_v55 = vld [vmem:[%s1718_s1 + $0x540] sm:$0xff] }
  0x2f   :  { %347 = vmatpush.msrb.mxu0 %v189_v24  ;;  %369 = vmatpush.msrb.mxu1 %v223_v25  ;;  %v175_v54 = vld [vmem:[%s1718_s1 + $0x430] sm:$0xff]  ;;  %v1250_v57 = vld [vmem:[%s1717_s0 + $0x40] sm:$0xff] }
  0x30   :  { %416 = vmatpush.msrb.mxu3 %v62_v26  ;;  %438 = vmatpush.msra.mxu2 %v96_v27  ;;  %v173_v59 = vld [vmem:[%s1718_s1 + $0x420] sm:$0xff]  ;;  %v207_v60 = vld [vmem:[%s1718_s1 + $0x530] sm:$0xff] }
  0x31   :  { %348 = vmatpush.msrb.mxu0 %v187_v28  ;;  %370 = vmatpush.msrb.mxu1 %v221_v29  ;;  %v1269_v62 = vld [vmem:[%s1717_s0 + $0x50] sm:$0xff]  ;;  %v205_v1 = vld [vmem:[%s1718_s1 + $0x520] sm:$0xff] }
  0x32   :  { %417 = vmatpush.msrb.mxu3 %v60_v30  ;;  %439 = vmatpush.msra.mxu2 %v94_v31  ;;  %v171_v0 = vld [vmem:[%s1718_s1 + $0x410] sm:$0xff] }
  0x33   :  { %349 = vmatpush.msrb.mxu0 %v185_v32  ;;  %371 = vmatpush.msrb.mxu1 %v219_v33  ;;  %v1286_v3 = vld [vmem:[%s1717_s0 + $0x30] sm:$0xff] }
  0x34   :  { %418 = vmatpush.msrb.mxu3 %v58_v34  ;;  %440 = vmatpush.msra.mxu2 %v92_v35 }
  0x35   :  { %350 = vmatpush.msrb.mxu0 %v183_v36  ;;  %372 = vmatpush.msrb.mxu1 %v217_v37 }
  0x36   :  { %419 = vmatpush.msrb.mxu3 %v56_v38  ;;  %441 = vmatpush.msra.mxu2 %v90_v39 }
  0x37   :  { %351 = vmatpush.msrb.mxu0 %v181_v40  ;;  %373 = vmatpush.msrb.mxu1 %v215_v41 }
  0x38   :  { %420 = vmatpush.msrb.mxu3 %v54_v42  ;;  %442 = vmatpush.msra.mxu2 %v88_v43 }
  0x39   :  { %352 = vmatpush.msrb.mxu0 %v179_v44  ;;  %374 = vmatpush.msrb.mxu1 %v213_v45 }
  0x3a   :  { %421 = vmatpush.msrb.mxu3 %v52_v46  ;;  %315 = vmatmul.f32.gmra.mxu2 %v1215_v47 }
  0x3b   :  { %443 = vmatpush.msra.mxu2 %v86_v48  ;;  %353 = vmatpush.msrb.mxu0 %v177_v49 }
  0x3c   :  { %375 = vmatpush.msrb.mxu1 %v211_v50  ;;  %422 = vmatpush.msrb.mxu3 %v50_v51 }
  0x3d   :  { %269 = vmatmul.f32.gmra.mxu0 %v1233_v52  ;;  %444 = vmatpush.msra.mxu2 %v84_v53 }
  0x3e   :  { %354 = vmatpush.msrb.mxu0 %v175_v54  ;;  %376 = vmatpush.msrb.mxu1 %v209_v55 }
  0x3f   :  { %423 = vmatpush.msrb.mxu3 %v48_v56  ;;  %292 = vmatmul.f32.gmra.mxu1 %v1250_v57 }
  0x40   :  { %445 = vmatpush.msra.mxu2 %v82_v58  ;;  %355 = vmatpush.msrb.mxu0 %v173_v59 }
  0x41   :  { %377 = vmatpush.msrb.mxu1 %v207_v60  ;;  %424 = vmatpush.msrb.mxu3 %v46_v61 }
  0x42   :  { %12 = vsyncpa [#allocation3], 0  ;;  %338 = vmatmul.f32.gmra.mxu3 %v1269_v62  ;;  %446 = vmatpush.msra.mxu2 %v80_v63  ;;  %v78_v4 = vld [vmem:[%s1718_s1 + $0x128] sm:$0xff]  ;;  %v169_v5 = vld [vmem:[%s1718_s1 + $0x400] sm:$0xff]  ;;  %s824_s21 = smov [#allocation2]   ;;  %s759_s24 = sshll.u32 %s1724_s7, 4  ;;  %s760_s24 = int_to_ptr.hbm [resolvable:$true] %s759_s24 }
  0x43   :  { %356 = vmatpush.msrb.mxu0 %v171_v0  ;;  %378 = vmatpush.msrb.mxu1 %v205_v1  ;;  %v203_v6 = vld [vmem:[%s1718_s1 + $0x510] sm:$0xff]  ;;  %v42_v8 = vld [vmem:[%s1718_s1 + $0x8] sm:$0xff]  ;;  %v1306_v9 = vld [vmem:[%s1717_s0 + $0x20] sm:$0xff]  ;;  %s757_s22 = sshll.u32 %s824_s21, 4  ;;  %s825_s25 = smov 128   ;;  %s758_s22 = int_to_ptr.vmem [resolvable:$true] %s757_s22 }
  0x44   :  { %425 = vmatpush.msrb.mxu3 %v44_v2  ;;  %771 = vmatmul.msk.f32.vlgmr.msrb.gmra.mxu2 %vm243_vm0, %v1286_v3  ;;  %v76_v10 = vld [vmem:[%s1718_s1 + $0x118] sm:$0xff]  ;;  %v201_v15 = vld [vmem:[%s1718_s1 + $0x500] sm:$0xff]  ;;  %v74_v16 = vld [vmem:[%s1718_s1 + $0x108] sm:$0xff]  ;;  %s826_s26 = smov 8  }
  0x45   :  { %447 = vmatpush.msra.mxu2 %v78_v4  ;;  %357 = vmatpush.msrb.mxu0 %v169_v5  ;;  %v136_v11 = vld [vmem:[%s1718_s1 + $0x2f8] sm:$0xff]  ;;  %v1327_v17 = vld [vmem:[%s1717_s0 + $0x28] sm:$0xff]  ;;  %v1393_v37 = vld [vmem:[%s1717_s0 + $0x60] sm:$0xff] }
  0x46   :  { %v200_v14 = vld [vmem:[%s1718_s1 + $0x4f8] sm:$0xff]  ;;  %379 = vmatpush.msrb.mxu1 %v203_v6  ;;  %426 = vmatpush.msrb.mxu3 %v42_v8  ;;  %v134_v19 = vld [vmem:[%s1718_s1 + $0x2e8] sm:$0xff] }
  0x47   :  { %358 = vmatmul.f32.vlgmr.msrb.gmra.mxu0 %v1306_v9  ;;  %448 = vmatpush.msra.mxu2 %v76_v10  ;;  %v168_v20 = vld [vmem:[%s1718_s1 + $0x3f8] sm:$0xff]  ;;  %v198_v21 = vld [vmem:[%s1718_s1 + $0x4e8] sm:$0xff] }
  0x48   :  { %457 = vmatpush.msra.mxu0 %v136_v11  ;;  %503 = vmatpush.msra.mxu3 %v200_v14  ;;  %v232_v22 = vld [vmem:[%s1718_s1 + $0x5f8] sm:$0xff]  ;;  %v166_v24 = vld [vmem:[%s1718_s1 + $0x3e8] sm:$0xff] }
  0x49   :  { %380 = vmatpush.msrb.mxu1 %v201_v15  ;;  %449 = vmatpush.msra.mxu2 %v74_v16  ;;  %v132_v23 = vld [vmem:[%s1718_s1 + $0x2d8] sm:$0xff]  ;;  %v230_v26 = vld [vmem:[%s1718_s1 + $0x5e8] sm:$0xff] }
  0x4a   :  { %381 = vmatmul.f32.vlgmr.msrb.gmra.mxu1 %v1327_v17  ;;  %458 = vmatpush.msra.mxu0 %v134_v19  ;;  %v196_v25 = vld [vmem:[%s1718_s1 + $0x4d8] sm:$0xff]  ;;  %v130_v27 = vld [vmem:[%s1718_s1 + $0x2c8] sm:$0xff] }
  0x4b   :  { %480 = vmatpush.msra.mxu1 %v168_v20  ;;  %504 = vmatpush.msra.mxu3 %v198_v21  ;;  %v1360_v28 = vld [vmem:[%s1717_s0 + $0x68] sm:$0xff]  ;;  %v164_v29 = vld [vmem:[%s1718_s1 + $0x3d8] sm:$0xff] }
  0x4c   :  { %526 = vmatpush.msrb.mxu2 %v232_v22  ;;  %459 = vmatpush.msra.mxu0 %v132_v23  ;;  %v194_v30 = vld [vmem:[%s1718_s1 + $0x4c8] sm:$0xff]  ;;  %v228_v31 = vld [vmem:[%s1718_s1 + $0x5d8] sm:$0xff] }
  0x4d   :  { %481 = vmatpush.msra.mxu1 %v166_v24  ;;  %505 = vmatpush.msra.mxu3 %v196_v25  ;;  %v1374_v32 = vld [vmem:[%s1717_s0 + $0x58] sm:$0xff]  ;;  %v162_v33 = vld [vmem:[%s1718_s1 + $0x3c8] sm:$0xff] }
  0x4e   :  { %527 = vmatpush.msrb.mxu2 %v230_v26  ;;  %460 = vmatpush.msra.mxu0 %v130_v27  ;;  %v128_v34 = vld [vmem:[%s1718_s1 + $0x2b8] sm:$0xff]  ;;  %v226_v36 = vld [vmem:[%s1718_s1 + $0x5c8] sm:$0xff] }
  0x4f   :  { %772 = vmatmul.msk.f32.gmra.mxu2 %vm243_vm0, %v1360_v28  ;;  %482 = vmatpush.msra.mxu1 %v164_v29  ;;  %v192_v35 = vld [vmem:[%s1718_s1 + $0x4b8] sm:$0xff]  ;;  %v126_v38 = vld [vmem:[%s1718_s1 + $0x2a8] sm:$0xff]  ;;  %v1581_v29 = vld [vmem:[%s1719_s2] sm:$0x3] }
  0x50   :  { %506 = vmatpush.msra.mxu3 %v194_v30  ;;  %528 = vmatpush.msrb.mxu2 %v228_v31  ;;  %v160_v39 = vld [vmem:[%s1718_s1 + $0x3b8] sm:$0xff]  ;;  %v190_v40 = vld [vmem:[%s1718_s1 + $0x4a8] sm:$0xff]  ;;  %v616_v30 = vld [vmem:[%s1720_s3 + $0x40] sm:$0xff] }
  0x51   :  { %361 = vmatmul.f32.gmra.mxu0 %v1374_v32  ;;  %483 = vmatpush.msra.mxu1 %v162_v33  ;;  %v224_v41 = vld [vmem:[%s1718_s1 + $0x5b8] sm:$0xff]  ;;  %v158_v43 = vld [vmem:[%s1718_s1 + $0x3a8] sm:$0xff] }
  0x52   :  { %461 = vmatpush.msra.mxu0 %v128_v34  ;;  %507 = vmatpush.msra.mxu3 %v192_v35  ;;  %v124_v42 = vld [vmem:[%s1718_s1 + $0x298] sm:$0xff]  ;;  %v222_v45 = vld [vmem:[%s1718_s1 + $0x5a8] sm:$0xff] }
  0x53   :  { %529 = vmatpush.msrb.mxu2 %v226_v36  ;;  %384 = vmatmul.f32.gmra.mxu1 %v1393_v37  ;;  %v188_v44 = vld [vmem:[%s1718_s1 + $0x498] sm:$0xff]  ;;  %v122_v46 = vld [vmem:[%s1718_s1 + $0x288] sm:$0xff]  ;;  %v614_v36 = vld [vmem:[%s1720_s3 + $0x30] sm:$0xff] }
  0x54   :  { %462 = vmatpush.msra.mxu0 %v126_v38  ;;  %484 = vmatpush.msra.mxu1 %v160_v39  ;;  %v156_v48 = vld [vmem:[%s1718_s1 + $0x398] sm:$0xff]  ;;  %v186_v49 = vld [vmem:[%s1718_s1 + $0x488] sm:$0xff]  ;;  %v612_v39 = vld [vmem:[%s1720_s3 + $0x20] sm:$0xff] }
  0x55   :  { %508 = vmatpush.msra.mxu3 %v190_v40  ;;  %530 = vmatpush.msrb.mxu2 %v224_v41  ;;  %v220_v50 = vld [vmem:[%s1718_s1 + $0x598] sm:$0xff]  ;;  %v154_v53 = vld [vmem:[%s1718_s1 + $0x388] sm:$0xff] }
  0x56   :  { %463 = vmatpush.msra.mxu0 %v124_v42  ;;  %485 = vmatpush.msra.mxu1 %v158_v43  ;;  %v120_v51 = vld [vmem:[%s1718_s1 + $0x278] sm:$0xff]  ;;  %v218_v55 = vld [vmem:[%s1718_s1 + $0x588] sm:$0xff]  ;;  %v610_v43 = vld [vmem:[%s1720_s3 + $0x10] sm:$0xff] }
  0x57   :  { %509 = vmatpush.msra.mxu3 %v188_v44  ;;  %531 = vmatpush.msrb.mxu2 %v222_v45  ;;  %v184_v54 = vld [vmem:[%s1718_s1 + $0x478] sm:$0xff]  ;;  %v118_v56 = vld [vmem:[%s1718_s1 + $0x268] sm:$0xff] }
  0x58   :  { %464 = vmatpush.msra.mxu0 %v122_v46  ;;  %486 = vmatpush.msra.mxu1 %v156_v48  ;;  %v152_v58 = vld [vmem:[%s1718_s1 + $0x378] sm:$0xff]  ;;  %v182_v59 = vld [vmem:[%s1718_s1 + $0x468] sm:$0xff] }
  0x59   :  { %510 = vmatpush.msra.mxu3 %v186_v49  ;;  %532 = vmatpush.msrb.mxu2 %v220_v50  ;;  %v216_v60 = vld [vmem:[%s1718_s1 + $0x578] sm:$0xff]  ;;  %v150_v61 = vld [vmem:[%s1718_s1 + $0x368] sm:$0xff] }
  0x5a   :  { %427 = vmatmul.f32.vlgmr.msrb.gmra.mxu3 %v1101_v12  ;;  %465 = vmatpush.msra.mxu0 %v120_v51  ;;  %v116_v12 = vld [vmem:[%s1718_s1 + $0x258] sm:$0xff]  ;;  %v214_v0 = vld [vmem:[%s1718_s1 + $0x568] sm:$0xff]  ;;  %v608_v51 = vld [vmem:[%s1720_s3] sm:$0xff] }
  0x5b   :  { %487 = vmatpush.msra.mxu1 %v154_v53  ;;  %511 = vmatpush.msra.mxu3 %v184_v54  ;;  %v180_v63 = vld [vmem:[%s1718_s1 + $0x458] sm:$0xff]  ;;  %v114_v1 = vld [vmem:[%s1718_s1 + $0x248] sm:$0xff] }
  0x5c   :  { %533 = vmatpush.msrb.mxu2 %v218_v55  ;;  %466 = vmatpush.msra.mxu0 %v118_v56  ;;  %v148_v2 = vld [vmem:[%s1718_s1 + $0x358] sm:$0xff]  ;;  %v146_v6 = vld [vmem:[%s1718_s1 + $0x348] sm:$0xff] }
  0x5d   :  { %450 = vmatmul.f32.vlgmr.msra.gmra.mxu2 %v1125_v18  ;;  %488 = vmatpush.msra.mxu1 %v152_v58  ;;  %v178_v18 = vld [vmem:[%s1718_s1 + $0x448] sm:$0xff]  ;;  %v212_v4 = vld [vmem:[%s1718_s1 + $0x558] sm:$0xff] }
  0x5e   :  { %512 = vmatpush.msra.mxu3 %v182_v59  ;;  %534 = vmatpush.msrb.mxu2 %v216_v60  ;;  %v112_v5 = vld [vmem:[%s1718_s1 + $0x238] sm:$0xff]  ;;  %v210_v10 = vld [vmem:[%s1718_s1 + $0x548] sm:$0xff] }
  0x5f   :  { %467 = vmatpush.msra.mxu0 %v116_v12  ;;  %489 = vmatpush.msra.mxu1 %v150_v61  ;;  %v176_v8 = vld [vmem:[%s1718_s1 + $0x438] sm:$0xff]  ;;  %v110_v11 = vld [vmem:[%s1718_s1 + $0x228] sm:$0xff] }
  0x60   :  { %513 = vmatpush.msra.mxu3 %v180_v63  ;;  %535 = vmatpush.msrb.mxu2 %v214_v0  ;;  %v144_v14 = vld [vmem:[%s1718_s1 + $0x338] sm:$0xff]  ;;  %v174_v15 = vld [vmem:[%s1718_s1 + $0x428] sm:$0xff] }
  0x61   :  { %468 = vmatpush.msra.mxu0 %v114_v1  ;;  %490 = vmatpush.msra.mxu1 %v148_v2  ;;  %v208_v16 = vld [vmem:[%s1718_s1 + $0x538] sm:$0xff]  ;;  %v142_v19 = vld [vmem:[%s1718_s1 + $0x328] sm:$0xff] }
  0x62   :  { %514 = vmatpush.msra.mxu3 %v178_v18  ;;  %536 = vmatpush.msrb.mxu2 %v212_v4  ;;  %v172_v20 = vld [vmem:[%s1718_s1 + $0x418] sm:$0xff]  ;;  %v206_v21 = vld [vmem:[%s1718_s1 + $0x528] sm:$0xff] }
  0x63   :  { %430 = vmatmul.f32.gmra.mxu3 %v1233_v52  ;;  %469 = vmatpush.msra.mxu0 %v112_v5  ;;  %v108_v52 = vld [vmem:[%s1718_s1 + $0x218] sm:$0xff]  ;;  %v106_v22 = vld [vmem:[%s1718_s1 + $0x208] sm:$0xff] }
  0x64   :  { %491 = vmatpush.msra.mxu1 %v146_v6  ;;  %515 = vmatpush.msra.mxu3 %v176_v8  ;;  %v140_v23 = vld [vmem:[%s1718_s1 + $0x318] sm:$0xff]  ;;  %v138_v25 = vld [vmem:[%s1718_s1 + $0x308] sm:$0xff] }
  0x65   :  { %537 = vmatpush.msrb.mxu2 %v210_v10  ;;  %470 = vmatpush.msra.mxu0 %v110_v11  ;;  %v204_v24 = vld [vmem:[%s1718_s1 + $0x518] sm:$0xff]  ;;  %v202_v26 = vld [vmem:[%s1718_s1 + $0x508] sm:$0xff] }
  0x66   :  { %453 = vmatmul.f32.gmra.mxu2 %v1250_v57  ;;  %492 = vmatpush.msra.mxu1 %v144_v14  ;;  %v170_v57 = vld [vmem:[%s1718_s1 + $0x408] sm:$0xff]  ;;  %v236_v27 = vld [vmem:[%s1718_s1 + $0x618] sm:$0xff] }
  0x67   :  { %516 = vmatpush.msra.mxu3 %v174_v15  ;;  %538 = vmatpush.msrb.mxu2 %v208_v16  ;;  %v615_v33 = vld [vmem:[%s1720_s3 + $0x38] sm:$0xff]  ;;  %v613_v38 = vld [vmem:[%s1720_s3 + $0x28] sm:$0xff] }
  0x68   :  { %471 = vmatpush.msra.mxu0 %v108_v52  ;;  %493 = vmatpush.msra.mxu1 %v142_v19  ;;  %v611_v42 = vld [vmem:[%s1720_s3 + $0x18] sm:$0xff]  ;;  %v609_v46 = vld [vmem:[%s1720_s3 + $0x8] sm:$0xff] }
  0x69   :  { %517 = vmatpush.msra.mxu3 %v172_v20  ;;  %539 = vmatpush.msrb.mxu2 %v206_v21  ;;  %v639_v16 = vld [vmem:[%s1720_s3 + $0xf8] sm:$0xff]  ;;  %v638_v21 = vld [vmem:[%s1720_s3 + $0xf0] sm:$0xff] }
  0x6a   :  { %472 = vmatpush.msra.mxu0 %v106_v22  ;;  %494 = vmatpush.msra.mxu1 %v140_v23 }
  0x6b   :  { %518 = vmatpush.msra.mxu3 %v170_v57  ;;  %473 = vmatmul.f32.vlgmr.msra.gmra.mxu0 %v1083_v7  ;;  %v234_v7 = vld [vmem:[%s1718_s1 + $0x608] sm:$0xff] }
  0x6c   :  { %519 = vmatmul.f32.vlgmr.msra.gmra.mxu3 %v1306_v9  ;;  %540 = vmatpush.msrb.mxu2 %v204_v24  ;;  %v619_v9 = vld [vmem:[%s1720_s3 + $0x58] sm:$0xff]  ;;  %v637_v57 = vld [vmem:[%s1720_s3 + $0xe8] sm:$0xff]  ;;  %v636_v24 = vld [vmem:[%s1720_s3 + $0xe0] sm:$0xff] }
  0x6d   :  { %495 = vmatpush.msra.mxu1 %v138_v25  ;;  %667 = vmatpush.msrb.mxu3 %v639_v16 }
  0x6e   :  { %496 = vmatmul.f32.vlgmr.msra.gmra.mxu1 %v1106_v13  ;;  %541 = vmatpush.msrb.mxu2 %v202_v26  ;;  %v623_v13 = vld [vmem:[%s1720_s3 + $0x78] sm:$0xff] }
  0x6f   :  { %542 = vmatmul.f32.vlgmr.msrb.gmra.mxu2 %v1327_v17  ;;  %644 = vmatpush.msrb.mxu1 %v623_v13  ;;  %v618_v17 = vld [vmem:[%s1720_s3 + $0x50] sm:$0xff]  ;;  %v635_v26 = vld [vmem:[%s1720_s3 + $0xd8] sm:$0xff] }
  0x70   :  { %563 = vmatpush.msra.mxu2 %v236_v27  ;;  %668 = vmatpush.msrb.mxu3 %v638_v21  ;;  %v634_v13 = vld [vmem:[%s1720_s3 + $0xd0] sm:$0xff] }
  0x72   :  { %564 = vmatpush.msra.mxu2 %v234_v7  ;;  %669 = vmatpush.msrb.mxu3 %v637_v57 }
  0x73   :  { %476 = vmatmul.f32.gmra.mxu0 %v1215_v47  ;;  %v622_v47 = vld [vmem:[%s1720_s3 + $0x70] sm:$0xff] }
  0x74   :  { %522 = vmatmul.f32.gmra.mxu3 %v1374_v32  ;;  %645 = vmatpush.msrb.mxu1 %v622_v47  ;;  %v239_v32 = vperm.slane %v1581_v29, 0 }
  0x75   :  { %670 = vmatpush.msrb.mxu3 %v636_v24  ;;  %v723_v24 = vld [vmem:[%s1722_s5 + $0x78] sm:$0xff] }
  0x76   :  { %499 = vmatmul.f32.gmra.mxu1 %v1269_v62  ;;  %v621_v62 = vld [vmem:[%s1720_s3 + $0x68] sm:$0xff]  ;;  %728 = vmatpush.msrb.mxu0 %v723_v24 }
  0x77   :  { %545 = vmatmul.f32.gmra.mxu2 %v1393_v37  ;;  %646 = vmatpush.msrb.mxu1 %v621_v62  ;;  %v633_v62 = vld [vmem:[%s1720_s3 + $0xc8] sm:$0xff] }
  0x78   :  { %671 = vmatpush.msrb.mxu3 %v635_v26  ;;  %v721_v26 = vld [vmem:[%s1722_s5 + $0x68] sm:$0xff] }
  0x7a   :  { %672 = vmatpush.msrb.mxu3 %v634_v13  ;;  %v718_v13 = vld [vmem:[%s1722_s5 + $0x50] sm:$0xff] }
  0x7c   :  { %673 = vmatpush.msrb.mxu3 %v633_v62  ;;  %v716_v62 = vld [vmem:[%s1722_s5 + $0x40] sm:$0xff] }
  0x7f   :  { %773 = vmatmul.msk.f32.vlgmr.msra.gmra.mxu2 %vm243_vm0, %v1286_v3  ;;  %v620_v3 = vld [vmem:[%s1720_s3 + $0x60] sm:$0xff] }
  0x80   :  { %647 = vmatpush.msrb.mxu1 %v620_v3 }
  0x82   :  { %648 = vmatpush.msrb.mxu1 %v619_v9 }
  0x84   :  { %649 = vmatpush.msrb.mxu1 %v618_v17 }
  0x87   :  { %774 = vmatmul.msk.f32.gmra.mxu2 %vm243_vm0, %v1360_v28  ;;  %v617_v28 = vld [vmem:[%s1720_s3 + $0x48] sm:$0xff] }
  0x88   :  { %650 = vmatpush.msrb.mxu1 %v617_v28  ;;  %v632_v28 = vld [vmem:[%s1720_s3 + $0xc0] sm:$0xff] }
  0x89   :  { %674 = vmatpush.msrb.mxu3 %v632_v28  ;;  %v712_v28 = vld [vmem:[%s1722_s5 + $0x20] sm:$0xff] }
  0x8a   :  { %651 = vmatpush.msrb.mxu1 %v616_v30 }
  0x8c   :  { %652 = vmatpush.msrb.mxu1 %v615_v33  ;;  %v630_v33 = vld [vmem:[%s1720_s3 + $0xb0] sm:$0xff] }
  0x8e   :  { %653 = vmatpush.msrb.mxu1 %v614_v36  ;;  %v628_v36 = vld [vmem:[%s1720_s3 + $0xa0] sm:$0xff] }
  0x90   :  { %654 = vmatpush.msrb.mxu1 %v613_v38  ;;  %v627_v38 = vld [vmem:[%s1720_s3 + $0x98] sm:$0xff] }
  0x92   :  { %655 = vmatpush.msrb.mxu1 %v612_v39 }
  0x94   :  { %656 = vmatpush.msrb.mxu1 %v611_v42 }
  0x96   :  { %657 = vmatpush.msrb.mxu1 %v610_v43  ;;  %v624_v43 = vld [vmem:[%s1720_s3 + $0x80] sm:$0xff] }
  0x98   :  { %658 = vmatpush.msrb.mxu1 %v609_v46 }
  0x9a   :  { %659 = vmatpush.msrb.mxu1 %v608_v51 }
  0xa6   :  { %v267_v31 = vpop.f32.mrf.mxu0 }
  0xa7   :  { %v268_v37 = vadd.f32 %v267_v31, %v239_v32  ;;  %v631_v31 = vld [vmem:[%s1720_s3 + $0xb8] sm:$0xff] }
  0xa8   :  { %675 = vmatpush.msrb.mxu3 %v631_v31  ;;  %v710_v31 = vld [vmem:[%s1722_s5 + $0x10] sm:$0xff] }
  0xa9   :  { %v290_v34 = vpop.f32.mrf.mxu1  ;;  %v313_v35 = vpop.f32.mrf.mxu2 }
  0xaa   :  { %v291_v41 = vadd.f32 %v290_v34, %v268_v37  ;;  %676 = vmatpush.msrb.mxu3 %v630_v33  ;;  %v629_v34 = vld [vmem:[%s1720_s3 + $0xa8] sm:$0xff]  ;;  %v708_v33 = vld [vmem:[%s1722_s5] sm:$0xff] }
  0xac   :  { %v314_v48 = vadd.f32 %v313_v35, %v291_v41  ;;  %v336_v49 = vpop.f32.mrf.mxu3  ;;  %677 = vmatpush.msrb.mxu3 %v629_v34  ;;  %v240_v35 = vperm.slane %v1581_v29, 1  ;;  %v625_v29 = vld [vmem:[%s1720_s3 + $0x88] sm:$0xff] }
  0xae   :  { %v337_v53 = vadd.f32 %v336_v49, %v314_v48  ;;  %678 = vmatpush.msrb.mxu3 %v628_v36 }
  0xb0   :  { %679 = vmatpush.msrb.mxu3 %v627_v38 }
  0xba   :  { %v270_v40 = vpop.f32.mrf.mxu0 }
  0xbb   :  { %v271_v50 = vadd.f32 %v270_v40, %v239_v32  ;;  %v626_v40 = vld [vmem:[%s1720_s3 + $0x90] sm:$0xff] }
  0xbc   :  { %v293_v44 = vpop.f32.mrf.mxu1  ;;  %680 = vmatpush.msrb.mxu3 %v626_v40 }
  0xbd   :  { %v316_v45 = vpop.f32.mrf.mxu2  ;;  %v294_v55 = vadd.f32 %v293_v44, %v271_v50 }
  0xbe   :  { %681 = vmatpush.msrb.mxu3 %v625_v29 }
  0xbf   :  { %v317_v12 = vadd.f32 %v316_v45, %v294_v55 }
  0xc0   :  { %682 = vmatpush.msrb.mxu3 %v624_v43 }
  0xc4   :  { %v359_v54 = vpop.f32.mrf.mxu0 }
  0xc5   :  { %v360_v56 = vadd.f32 %v359_v54, %v337_v53  ;;  %v339_v61 = vpop.f32.mrf.mxu3 }
  0xc6   :  { %v340_v1 = vadd.f32 %v339_v61, %v317_v12 }
  0xc7   :  { %v382_v58 = vpop.f32.mrf.mxu1  ;;  %v405_v59 = vpop.f32.mrf.mxu2 }
  0xc8   :  { %v383_v60 = vadd.f32 %v382_v58, %v360_v56 }
  0xca   :  { %v406_v63 = vadd.f32 %v405_v59, %v383_v60 }
  0xcc   :  { %v572_v0 = vmin.f32 %v406_v63, 0.0  ;;  %v600_v22 = vmul.f32 1.0507, %v406_v63  ;;  %vm596_vm1 = vcmp.lt.f32.partialorder %v406_v63, 0.0 }
  0xce   :  { %v576_v2 = vmul.f32 1.0507, %v572_v0  ;;  %v362_v18 = vpop.f32.mrf.mxu0 }
  0xcf   :  { %v363_v4 = vadd.f32 %v362_v18, %v340_v1 }
  0xd0   :  { %v580_v5 = vmul.f32 1.442695, %v576_v2  ;;  %v385_v6 = vpop.f32.mrf.mxu1 }
  0xd1   :  { %v386_v8 = vadd.f32 %v385_v6, %v363_v4 }
  0xd2   :  { %786 = vpow2.f32 %v580_v5  ;;  %v408_v10 = vpop.f32.mrf.mxu2 }
  0xd3   :  { %v409_v11 = vadd.f32 %v408_v10, %v386_v8 }
  0xd5   :  { %v574_v14 = vmin.f32 %v409_v11, 0.0  ;;  %v602_v17 = vmul.f32 1.0507, %v409_v11  ;;  %vm598_vm2 = vcmp.lt.f32.partialorder %v409_v11, 0.0 }
  0xd7   :  { %v578_v15 = vmul.f32 1.0507, %v574_v14 }
  0xd8   :  { %v787_v52 = vpop.eup %786 }
  0xd9   :  { %v775_v19 = vadd.f32 -1.0, %v787_v52  ;;  %v584_v20 = vmul.f32 1.442695, %v578_v15 }
  0xdb   :  { %788 = vpow2.f32 %v584_v20  ;;  %v592_v23 = vmul.f32 1.67326, %v775_v19 }
  0xdd   :  { %v604_v25 = vsel %vm596_vm1, %v592_v23, %v600_v22  ;;  %v428_v3 = vpop.f32.mrf.mxu3 }
  0xde   :  { %660 = vmatmul.f32.vlgmr.msrb.gmra.mxu1 %v604_v25  ;;  %v429_v39 = vadd.f32 %v428_v3, %v240_v35  ;;  %v722_v25 = vld [vmem:[%s1722_s5 + $0x70] sm:$0xff]  ;;  %v715_v3 = vld [vmem:[%s1722_s5 + $0x38] sm:$0xff] }
  0xdf   :  { %729 = vmatpush.msrb.mxu0 %v722_v25 }
  0xe0   :  { %v451_v27 = vpop.f32.mrf.mxu2 }
  0xe1   :  { %v789_v7 = vpop.eup %788  ;;  %v452_v44 = vadd.f32 %v451_v27, %v429_v39  ;;  %v720_v27 = vld [vmem:[%s1722_s5 + $0x60] sm:$0xff]  ;;  %730 = vmatpush.msrb.mxu0 %v721_v26 }
  0xe2   :  { %v777_v47 = vadd.f32 -1.0, %v789_v7  ;;  %v719_v7 = vld [vmem:[%s1722_s5 + $0x58] sm:$0xff] }
  0xe3   :  { %731 = vmatpush.msrb.mxu0 %v720_v27 }
  0xe4   :  { %v594_v9 = vmul.f32 1.67326, %v777_v47  ;;  %v717_v47 = vld [vmem:[%s1722_s5 + $0x48] sm:$0xff] }
  0xe5   :  { %732 = vmatpush.msrb.mxu0 %v719_v7 }
  0xe6   :  { %v606_v30 = vsel %vm598_vm2, %v594_v9, %v602_v17  ;;  %v431_v37 = vpop.f32.mrf.mxu3  ;;  %v714_v9 = vld [vmem:[%s1722_s5 + $0x30] sm:$0xff]  ;;  %v713_v17 = vld [vmem:[%s1722_s5 + $0x28] sm:$0xff] }
  0xe7   :  { %663 = vmatmul.f32.gmra.mxu1 %v606_v30  ;;  %v432_v49 = vadd.f32 %v431_v37, %v240_v35  ;;  %733 = vmatpush.msrb.mxu0 %v718_v13  ;;  %v711_v30 = vld [vmem:[%s1722_s5 + $0x18] sm:$0xff]  ;;  %v784_v35 = vld [vmem:[%s1721_s4] ss:$0 sm:$0xff] }
  0xe8   :  { %v474_v41 = vpop.f32.mrf.mxu0 }
  0xe9   :  { %v454_v32 = vpop.f32.mrf.mxu2  ;;  %v475_v46 = vadd.f32 %v474_v41, %v452_v44  ;;  %734 = vmatpush.msrb.mxu0 %v717_v47 }
  0xea   :  { %v455_v54 = vadd.f32 %v454_v32, %v432_v49  ;;  %v709_v32 = vld [vmem:[%s1722_s5 + $0x8] sm:$0xff] }
  0xeb   :  { %v497_v45 = vpop.f32.mrf.mxu1  ;;  %735 = vmatpush.msrb.mxu0 %v716_v62 }
  0xec   :  { %v498_v51 = vadd.f32 %v497_v45, %v475_v46 }
  0xed   :  { %736 = vmatpush.msrb.mxu0 %v715_v3 }
  0xef   :  { %v520_v48 = vpop.f32.mrf.mxu3  ;;  %737 = vmatpush.msrb.mxu0 %v714_v9 }
  0xf0   :  { %v477_v53 = vpop.f32.mrf.mxu0  ;;  %v521_v55 = vadd.f32 %v520_v48, %v498_v51 }
  0xf1   :  { %v478_v56 = vadd.f32 %v477_v53, %v455_v54  ;;  %738 = vmatpush.msrb.mxu0 %v713_v17 }
  0xf2   :  { %v543_v42 = vpop.f32.mrf.mxu2 }
  0xf3   :  { %v500_v58 = vpop.f32.mrf.mxu1  ;;  %v544_v59 = vadd.f32 %v543_v42, %v521_v55  ;;  %739 = vmatpush.msrb.mxu0 %v712_v28 }
  0xf4   :  { %v501_v61 = vadd.f32 %v500_v58, %v478_v56 }
  0xf5   :  { %740 = vmatpush.msrb.mxu0 %v711_v30 }
  0xf7   :  { %v523_v60 = vpop.f32.mrf.mxu3  ;;  %741 = vmatpush.msrb.mxu0 %v710_v31 }
  0xf8   :  { %v524_v0 = vadd.f32 %v523_v60, %v501_v61 }
  0xf9   :  { %742 = vmatpush.msrb.mxu0 %v709_v32 }
  0xfa   :  { %v546_v50 = vpop.f32.mrf.mxu2 }
  0xfb   :  { %v547_v18 = vadd.f32 %v546_v50, %v524_v0  ;;  %743 = vmatpush.msrb.mxu0 %v708_v33 }
 0x102   :  { %v566_v12 = vpop.f32.mrf.mxu2 }
 0x103   :  { %v567_v63 = vadd.f32 %v566_v12, %v544_v59  ;;  %v785_v12 = vld [vmem:[%s1723_s6] ss:$0 sm:$0xff] }
 0x105   :  { %v573_v1 = vmin.f32 %v567_v63, 0.0  ;;  %v601_v16 = vmul.f32 1.0507, %v567_v63  ;;  %vm597_vm3 = vcmp.lt.f32.partialorder %v567_v63, 0.0 }
 0x107   :  { %v577_v2 = vmul.f32 1.0507, %v573_v1 }
 0x109   :  { %v582_v4 = vmul.f32 1.442695, %v577_v2 }
 0x10a   :  { %v569_v5 = vpop.f32.mrf.mxu2 }
 0x10b   :  { %790 = vpow2.f32 %v582_v4  ;;  %v570_v6 = vadd.f32 %v569_v5, %v547_v18 }
 0x10d   :  { %v575_v8 = vmin.f32 %v570_v6, 0.0  ;;  %v603_v23 = vmul.f32 1.0507, %v570_v6  ;;  %vm599_vm4 = vcmp.lt.f32.partialorder %v570_v6, 0.0 }
 0x10f   :  { %v579_v10 = vmul.f32 1.0507, %v575_v8 }
 0x111   :  { %v791_v11 = vpop.eup %790  ;;  %v586_v14 = vmul.f32 1.442695, %v579_v10 }
 0x112   :  { %v776_v15 = vadd.f32 -1.0, %v791_v11 }
 0x113   :  { %792 = vpow2.f32 %v586_v14 }
 0x114   :  { %v593_v52 = vmul.f32 1.67326, %v776_v15 }
 0x116   :  { %v605_v19 = vsel %vm597_vm3, %v593_v52, %v601_v16 }
 0x117   :  { %683 = vmatmul.f32.vlgmr.msrb.gmra.mxu3 %v605_v19 }
 0x119   :  { %v793_v20 = vpop.eup %792 }
 0x11a   :  { %v778_v21 = vadd.f32 -1.0, %v793_v20 }
 0x11c   :  { %v595_v22 = vmul.f32 1.67326, %v778_v21 }
 0x11e   :  { %v607_v57 = vsel %vm599_vm4, %v595_v22, %v603_v23 }
 0x11f   :  { %686 = vmatmul.f32.gmra.mxu3 %v607_v57 }
 0x15b   :  { %v661_v34 = vpop.f32.mrf.mxu1 }
 0x15c   :  { %v662_v36 = vadd.f32 %v784_v35, %v661_v34 }
 0x164   :  { %v664_v40 = vpop.f32.mrf.mxu1 }
 0x165   :  { %v665_v42 = vadd.f32 %v784_v35, %v664_v40 }
 0x19a   :  { %v684_v37 = vpop.f32.mrf.mxu3 }
 0x19b   :  { %v685_v38 = vadd.f32 %v684_v37, %v662_v36 }
 0x19d   :  { %v690_v39 = vmin.f32 %v685_v38, 0.0  ;;  %v704_v51 = vmul.f32 1.0507, %v685_v38  ;;  %vm702_vm5 = vcmp.lt.f32.partialorder %v685_v38, 0.0 }
 0x19f   :  { %v692_v41 = vmul.f32 1.0507, %v690_v39 }
 0x1a1   :  { %v694_v29 = vmul.f32 1.442695, %v692_v41 }
 0x1a2   :  { %v687_v43 = vpop.f32.mrf.mxu3 }
 0x1a3   :  { %794 = vpow2.f32 %v694_v29  ;;  %v688_v44 = vadd.f32 %v687_v43, %v665_v42 }
 0x1a5   :  { %v691_v45 = vmin.f32 %v688_v44, 0.0  ;;  %v705_v59 = vmul.f32 1.0507, %v688_v44  ;;  %vm703_vm6 = vcmp.lt.f32.partialorder %v688_v44, 0.0 }
 0x1a7   :  { %v693_v46 = vmul.f32 1.0507, %v691_v45 }
 0x1a9   :  { %v795_v48 = vpop.eup %794  ;;  %v696_v49 = vmul.f32 1.442695, %v693_v46 }
 0x1aa   :  { %v779_v50 = vadd.f32 -1.0, %v795_v48 }
 0x1ab   :  { %796 = vpow2.f32 %v696_v49 }
 0x1ac   :  { %v700_v53 = vmul.f32 1.67326, %v779_v50 }
 0x1ae   :  { %v706_v54 = vsel %vm702_vm5, %v700_v53, %v704_v51 }
 0x1af   :  { %744 = vmatmul.f32.vlgmr.msrb.gmra.mxu0 %v706_v54 }
 0x1b1   :  { %v797_v55 = vpop.eup %796 }
 0x1b2   :  { %v780_v56 = vadd.f32 -1.0, %v797_v55 }
 0x1b4   :  { %v701_v58 = vmul.f32 1.67326, %v780_v56 }
 0x1b6   :  { %v707_v60 = vsel %vm703_vm6, %v701_v58, %v705_v59 }
 0x1b7   :  { %747 = vmatmul.f32.gmra.mxu0 %v707_v60 }
 0x22c   :  { %v745_v61 = vpop.f32.mrf.mxu0 }
 0x22d   :  { %v746_v63 = vadd.f32 %v785_v12, %v745_v61 }
 0x22f   :  { %751 = vst [vmem:[#allocation2] sm:$0xff] %v746_v63 }
 0x234   :  { %v748_v0 = vpop.f32.mrf.mxu0 }
 0x235   :  { %v749_v1 = vadd.f32 %v785_v12, %v748_v0 }
 0x237   :  { %752 = vst [vmem:[#allocation2 + $0x8] sm:$0xff] %v749_v1 }
 0x238   :  { %765 = dma.vmem_to_hbm [thread:$0]  %s758_s22, 256, %s760_s24, [#allocation3], %s825_s25, %s825_s25, %s826_s26  }
 0x239   :  { %822 = dma.done.wait [#allocation3], 256  }
 0x23a   :  { %823 = vsyncadd [#allocation3], 4294967040 }
 0x23b   :  { %770 = vsyncpa [#allocation3], 1 }

</bundles_post_ra>
